<compile_context>
chip_gen: v7x
topology: tpu7x:2x2x1
jax: 0.10.0
libtpu: 0.0.40
codegen_flags: <defaults>
</compile_context>

<pallas_src>
import functools
import math

import jax
import jax.numpy as jnp
from jax.experimental import pallas as pl
from jax.experimental.pallas import tpu as pltpu


# ----------------------------- device-aware tiling -----------------------------

def _device_kind():
    try:
        return jax.devices()[0].device_kind.lower()
    except Exception:
        return ""


_KIND = _device_kind()
_IS_V5E = ("v5 lite" in _KIND) or ("v5e" in _KIND) or ("v5litepod" in _KIND)
_IS_V6 = "v6" in _KIND
_IS_V7 = "v7" in _KIND

if _IS_V6:
    _FFN_ROW, _FFN_HID = 512, 512        # 128 MiB VMEM: big row tile -> ~compute bound
elif _IS_V7:
    _FFN_ROW, _FFN_HID = 256, 256        # 64 MiB VMEM: keep footprint well under limit
elif _IS_V5E:
    _FFN_ROW, _FFN_HID = 256, 512
else:
    _FFN_ROW, _FFN_HID = 256, 256

_PROJ_ROW = 512                          # fused-norm QKV projection row tile
_OUT_ROW, _OUT_COL = 256, 256            # LN + out-proj tiles
_Q_TILE = 256                            # flash-attention query tile target
_KV_TILE = 128 if _IS_V5E else 256       # 128 fills v5e MXU; 256 for v6e/v7x
_STATS_LANES = 128                       # lane-dense online-softmax stats


def _pick(dim, target, align):
    """Largest multiple of `align` that divides `dim` and is <= target (else full dim)."""
    if dim <= target:
        return dim
    t = (target // align) * align
    while t >= align:
        if dim % t == 0:
            return t
        t -= align
    return dim


def _vmem_limit_bytes():
    try:
        return int(pltpu.get_tpu_info().vmem_capacity_bytes) * 3 // 4
    except Exception:
        return 48 * 1024 * 1024


def _cparams(semantics):
    return pltpu.CompilerParams(dimension_semantics=semantics,
                                vmem_limit_bytes=_vmem_limit_bytes())


def _apply_rope(x, cos, sin):
    """Rotate-half RoPE: [x1, x2] -> [x1*c - x2*s, x2*c + x1*s]."""
    half = x.shape[-1] // 2
    x1 = x[:, :half]
    x2 = x[:, half:]
    return jnp.concatenate([x1 * cos - x2 * sin, x2 * cos + x1 * sin], axis=-1)


# ------------ fused RMSNorm + combined QKV projection (+bias) + RoPE ------------

def _rms_qkv_rope_kernel(x_ref, g_ref, w_ref, b_ref, cos_ref, sin_ref, o_ref,
                         xn_ref, *, eps, n_rope_heads):
    h = pl.program_id(2)

    @pl.when(h == 0)          # normalize x once per row tile; reused by every head
    def _():
        x = x_ref[...].astype(jnp.float32)
        inv = jax.lax.rsqrt(jnp.mean(x * x, axis=-1, keepdims=True) + eps)
        xn_ref[...] = ((x * inv) * g_ref[...]).astype(xn_ref.dtype)

    acc = jnp.dot(xn_ref[...], w_ref[...], preferred_element_type=jnp.float32)
    acc = acc + b_ref[...]

    @pl.when(h < n_rope_heads)          # Q heads (pre-scaled by 1/sqrt(D)) and K heads
    def _():
        o_ref[...] = _apply_rope(acc, cos_ref[...], sin_ref[...]).astype(o_ref.dtype)

    @pl.when(h >= n_rope_heads)         # V heads: plain projection
    def _():
        o_ref[...] = acc.astype(o_ref.dtype)


def rms_qkv_rope_proj(x, g, w, b, cos, sin, *, n_rope_heads, eps=1e-6,
                      out_dtype=jnp.bfloat16):
    """x: (B,S,E) f32; w: (NH,E,D) bf16; b: (NH,1,D) f32; cos/sin: (S, D//2) f32.
    Returns head-major (B, NH, S, D); the first n_rope_heads heads are RoPE'd."""
    B, S, E = x.shape
    NH, _, D = w.shape
    half = cos.shape[-1]
    tm = _pick(S, _PROJ_ROW, 8)
    return pl.pallas_call(
        functools.partial(_rms_qkv_rope_kernel, eps=eps, n_rope_heads=n_rope_heads),
        out_shape=jax.ShapeDtypeStruct((B, NH, S, D), out_dtype),
        grid=(B, S // tm, NH),                      # heads innermost: x read/normed once
        in_specs=[
            pl.BlockSpec((None, tm, E), lambda bb, s, h: (bb, s, 0)),
            pl.BlockSpec((1, E), lambda bb, s, h: (0, 0)),
            pl.BlockSpec((None, E, D), lambda bb, s, h: (h, 0, 0)),
            pl.BlockSpec((None, 1, D), lambda bb, s, h: (h, 0, 0)),
            pl.BlockSpec((tm, half), lambda bb, s, h: (s, 0)),
            pl.BlockSpec((tm, half), lambda bb, s, h: (s, 0)),
        ],
        out_specs=pl.BlockSpec((None, None, tm, D), lambda bb, s, h: (bb, h, s, 0)),
        scratch_shapes=[pltpu.VMEM((tm, E), jnp.bfloat16)],   # cached RMSNorm output
        compiler_params=_cparams(("parallel", "parallel", "arbitrary")),
    )(x, g, w, b, cos, sin)


# ----------------------------- flash GQA attention -----------------------------

def _flash_gqa_kernel(q_ref, k_ref, v_ref, o_ref, m_ref, l_ref, acc_ref, *,
                      is_causal, groups, head_dim, block_q, block_kv):
    qi = pl.program_id(2)
    ki = pl.program_id(3)
    G, D = groups, head_dim
    M = G * block_q

    @pl.when(ki == 0)
    def _():
        m_ref[...] = jnp.full(m_ref.shape, -1e30, jnp.float32)
        l_ref[...] = jnp.zeros(l_ref.shape, jnp.float32)
        acc_ref[...] = jnp.zeros(acc_ref.shape, jnp.float32)

    def _compute():
        # Q already RoPE'd and pre-scaled; K already RoPE'd (at projection time).
        q = q_ref[...].reshape(M, D)                 # (G*tq, D) bf16, one fused matmul
        k = k_ref[...]                               # (tkv, D)  bf16
        v = v_ref[...]                               # (tkv, D)  bf16
        s = jax.lax.dot_general(q, k, (((1,), (1,)), ((), ())),
                                preferred_element_type=jnp.float32)   # (M, tkv)
        if is_causal:
            rows = jax.lax.broadcasted_iota(jnp.int32, (M, block_kv), 0) % block_q
            cols = jax.lax.broadcasted_iota(jnp.int32, (M, block_kv), 1)
            keep = (ki * block_kv + cols) <= (qi * block_q + rows)
            s = jnp.where(keep, s, -1e30)
        m_prev = m_ref[...]                                           # (M, 128)
        m_next = jnp.maximum(m_prev, jnp.max(s, axis=-1, keepdims=True))
        alpha = jnp.exp(m_prev - m_next)
        p = jnp.exp(s - m_next[:, :1])
        l_ref[...] = alpha * l_ref[...] + jnp.sum(p, axis=-1, keepdims=True)
        acc_ref[...] = alpha[:, :1] * acc_ref[...] + jnp.dot(
            p.astype(v.dtype), v, preferred_element_type=jnp.float32)
        m_ref[...] = m_next

    if is_causal:
        # Skip compute for kv blocks entirely above the causal diagonal.
        pl.when(ki * block_kv <= qi * block_q + (block_q - 1))(_compute)
    else:
        _compute()

    @pl.when(ki == pl.num_programs(3) - 1)
    def _():
        inv = 1.0 / l_ref[...][:, :1]                 # exact reciprocal (parity-safe)
        out = (acc_ref[...] * inv).astype(o_ref.dtype)                # (M, D)
        for g in range(G):
            o_ref[:, g * D:(g + 1) * D] = out[g * block_q:(g + 1) * block_q, :]


def flash_gqa(qkv, *, batch, seq, n_q_heads, n_kv_heads, head_dim, is_causal,
              out_dtype=jnp.bfloat16):
    """qkv: (B, Hq + 2*Hk, S, D) bf16: Q heads (RoPE'd, pre-scaled), K heads (RoPE'd),
    then V heads. Returns (B, Hk, S, G*D)."""
    G = n_q_heads // n_kv_heads
    D = head_dim
    tq = _pick(seq, max(128, min(_Q_TILE, 1024 // max(G, 1))), 8)
    tkv = _pick(seq, _KV_TILE, 8)

    def _kv_block(i, j):
        if is_causal:
            # Clamp: fully-masked kv blocks repeat the previous index -> Pallas skips DMA.
            return jnp.minimum(j, (i * tq + tq - 1) // tkv)
        return j

    return pl.pallas_call(
        functools.partial(_flash_gqa_kernel, is_causal=is_causal, groups=G,
                          head_dim=D, block_q=tq, block_kv=tkv),
        out_shape=jax.ShapeDtypeStruct((batch, n_kv_heads, seq, G * D), out_dtype),
        grid=(batch, n_kv_heads, seq // tq, seq // tkv),
        in_specs=[
            pl.BlockSpec((None, G, tq, D), lambda b, h, i, j: (b, h, i, 0)),
            pl.BlockSpec((None, None, tkv, D),
                         lambda b, h, i, j: (b, n_q_heads + h, _kv_block(i, j), 0)),
            pl.BlockSpec((None, None, tkv, D),
                         lambda b, h, i, j: (b, n_q_heads + n_kv_heads + h,
                                             _kv_block(i, j), 0)),
        ],
        out_specs=pl.BlockSpec((None, None, tq, G * D), lambda b, h, i, j: (b, h, i, 0)),
        scratch_shapes=[
            pltpu.VMEM((G * tq, _STATS_LANES), jnp.float32),   # running max
            pltpu.VMEM((G * tq, _STATS_LANES), jnp.float32),   # running denominator
            pltpu.VMEM((G * tq, D), jnp.float32),              # running numerator
        ],
        compiler_params=_cparams(("parallel", "parallel", "parallel", "arbitrary")),
    )(qkv, qkv, qkv)


# ---------------- fused LayerNorm + out-projection + bias + residual ----------------

def _ln_outproj_kernel(a_ref, g_ref, bln_ref, w_ref, bias_ref, r_ref, o_ref, y_ref, *,
                       eps):
    @pl.when(pl.program_id(2) == 0)
    def _():
        heads = a_ref.shape[0]
        a = jnp.concatenate([a_ref[h] for h in range(heads)],
                            axis=-1).astype(jnp.float32)              # (tm, E)
        mu = jnp.mean(a, axis=-1, keepdims=True)
        var = jnp.mean(jnp.square(a - mu), axis=-1, keepdims=True)
        y = (a - mu) * jax.lax.rsqrt(var + eps) * g_ref[...] + bln_ref[...]
        y_ref[...] = y.astype(y_ref.dtype)

    acc = jnp.dot(y_ref[...], w_ref[...], preferred_element_type=jnp.float32)
    o_ref[...] = (acc + bias_ref[...] + r_ref[...].astype(jnp.float32)).astype(o_ref.dtype)


def ln_outproj_residual(attn, g, bln, w, bias, residual, *, eps=1e-5):
    B, Hk, S, GD = attn.shape
    E = Hk * GD
    tm = _pick(S, _OUT_ROW, 8)
    tn = _pick(E, _OUT_COL, 128)
    return pl.pallas_call(
        functools.partial(_ln_outproj_kernel, eps=eps),
        out_shape=jax.ShapeDtypeStruct((B, S, E), residual.dtype),
        grid=(B, S // tm, E // tn),
        in_specs=[
            pl.BlockSpec((None, Hk, tm, GD), lambda b, s, j: (b, 0, s, 0)),
            pl.BlockSpec((1, E), lambda b, s, j: (0, 0)),
            pl.BlockSpec((1, E), lambda b, s, j: (0, 0)),
            pl.BlockSpec((E, tn), lambda b, s, j: (0, j)),
            pl.BlockSpec((1, tn), lambda b, s, j: (0, j)),
            pl.BlockSpec((None, tm, tn), lambda b, s, j: (b, s, j)),
        ],
        out_specs=pl.BlockSpec((None, tm, tn), lambda b, s, j: (b, s, j)),
        scratch_shapes=[pltpu.VMEM((tm, E), jnp.bfloat16)],           # cached LN output
        compiler_params=_cparams(("parallel", "parallel", "arbitrary")),
    )(attn, g, bln, w, bias, residual)


# -------------- fused RMSNorm + SwiGLU FFN + down-proj + residual --------------

def _ffn_kernel(x_ref, g_ref, w1_ref, w3_ref, w2_ref, o_ref, acc_ref, xn_ref, *, eps):
    k = pl.program_id(1)

    @pl.when(k == 0)
    def _():
        x = x_ref[...].astype(jnp.float32)
        inv = jax.lax.rsqrt(jnp.mean(x * x, axis=-1, keepdims=True) + eps)
        xn_ref[...] = ((x * inv) * g_ref[...]).astype(xn_ref.dtype)
        acc_ref[...] = jnp.zeros(acc_ref.shape, jnp.float32)

    xn = xn_ref[...]                                                  # (tm, E) bf16
    h1 = jnp.dot(xn, w1_ref[...], preferred_element_type=jnp.float32)
    h3 = jnp.dot(xn, w3_ref[...], preferred_element_type=jnp.float32)
    hact = (h1 * jax.nn.sigmoid(h1)) * h3                             # SiLU(x@w1) * (x@w3)
    acc_ref[...] += jnp.dot(hact.astype(w2_ref.dtype), w2_ref[...],
                            preferred_element_type=jnp.float32)

    @pl.when(k == pl.num_programs(1) - 1)
    def _():
        o_ref[...] = (acc_ref[...] + x_ref[...].astype(jnp.float32)).astype(o_ref.dtype)


def ffn_swiglu_residual(x, g, w1, w3, w2, *, eps=1e-6):
    """x: (T, E) f32 flattened tokens."""
    T, E = x.shape
    H = w1.shape[1]
    tm = _pick(T, _FFN_ROW, 8)
    th = _pick(H, _FFN_HID, 128)
    return pl.pallas_call(
        functools.partial(_ffn_kernel, eps=eps),
        out_shape=jax.ShapeDtypeStruct((T, E), x.dtype),
        grid=(T // tm, H // th),
        in_specs=[
            pl.BlockSpec((tm, E), lambda t, k: (t, 0)),
            pl.BlockSpec((1, E), lambda t, k: (0, 0)),
            pl.BlockSpec((E, th), lambda t, k: (0, k)),
            pl.BlockSpec((E, th), lambda t, k: (0, k)),
            pl.BlockSpec((th, E), lambda t, k: (k, 0)),
        ],
        out_specs=pl.BlockSpec((tm, E), lambda t, k: (t, 0)),
        scratch_shapes=[pltpu.VMEM((tm, E), jnp.float32),             # f32 accumulator
                        pltpu.VMEM((tm, E), jnp.bfloat16)],           # cached RMSNorm out
        compiler_params=_cparams(("parallel", "arbitrary")),
    )(x, g, w1, w3, w2)


# ------------------------------ LlamaBlock forward ------------------------------

def llama_block_forward(params, x, is_causal=False, attn_mask=None):
    # TODO(synk): explicit attn_mask tensors are not supported (only None + is_causal).
    assert attn_mask is None
    B, S, E = x.shape
    Hq = params["query_heads"]
    Hk = params["kv_heads"]
    D = E // Hq

    # RMSNorm -> fused QKV projection (+bias) with RoPE on Q/K (Q pre-scaled by 1/sqrt(D)).
    qkv = rms_qkv_rope_proj(x, params["norm1_w"], params["wqkv"], params["bqkv"],
                            params["rope_cos"], params["rope_sin"],
                            n_rope_heads=Hq + Hk)                     # (B, Hq+2Hk, S, D)

    # Flash GQA attention (online softmax, causal kv-block DMA+compute skipping).
    attn = flash_gqa(qkv, batch=B, seq=S, n_q_heads=Hq, n_kv_heads=Hk, head_dim=D,
                     is_causal=is_causal)                             # (B, Hk, S, G*D)

    # LayerNorm(concat heads) -> out projection (+bias) -> + residual1.
    x2 = ln_outproj_residual(attn, params["ln_g"], params["ln_b"],
                             params["wo"], params["bo"], x)           # (B, S, E) f32

    # RMSNorm -> SwiGLU FFN -> + residual2 (flattened token axis).
    out = ffn_swiglu_residual(x2.reshape(B * S, E), params["norm2_w"],
                              params["w1"], params["w3"], params["w2"])
    return out.reshape(B, S, E)


# -------------------------------- parameter setup --------------------------------

def make_params(key, embed_dim, query_heads, kv_heads, seq_len,
                hidden_dim=4 * 4096, multiple_of=256, ffn_dim_multiplier=None):
    E = embed_dim
    D = E // query_heads
    kv_dim = kv_heads * D
    # Same hidden-dim arithmetic as the torch FeedForward.
    h = int(2 * hidden_dim / 3)
    if ffn_dim_multiplier is not None:
        h = int(ffn_dim_multiplier * h)
    h = multiple_of * ((h + multiple_of - 1) // multiple_of)

    ks = jax.random.split(key, 13)
    nrm = lambda k, s: 0.02 * jax.random.normal(k, s, jnp.float32)

    wq, bq = nrm(ks[2], (E, E)), nrm(ks[3], (E,))
    wk, bk = nrm(ks[4], (E, kv_dim)), nrm(ks[5], (kv_dim,))
    wv, bv = nrm(ks[6], (E, kv_dim)), nrm(ks[7], (kv_dim,))

    # Head-major combined QKV weight (NH, E, D): Q heads first (pre-scaled by 1/sqrt(D)
    # so the softmax scale is free at runtime), then K heads, then V heads.
    scale = 1.0 / math.sqrt(D)
    wq_h = (wq * scale).reshape(E, query_heads, D).transpose(1, 0, 2)
    wk_h = wk.reshape(E, kv_heads, D).transpose(1, 0, 2)
    wv_h = wv.reshape(E, kv_heads, D).transpose(1, 0, 2)
    wqkv = jnp.concatenate([wq_h, wk_h, wv_h], axis=0).astype(jnp.bfloat16)
    bqkv = jnp.concatenate([(bq * scale).reshape(query_heads, 1, D),
                            bk.reshape(kv_heads, 1, D),
                            bv.reshape(kv_heads, 1, D)], axis=0)      # f32 (NH, 1, D)

    # RoPE tables (rotate-half / Llama convention, theta=10000), stored (S, D//2).
    half = D // 2
    inv_freq = 1.0 / (10000.0 ** (jnp.arange(half, dtype=jnp.float32) / half))
    freqs = jnp.outer(jnp.arange(seq_len, dtype=jnp.float32), inv_freq)

    return dict(
        query_heads=query_heads, kv_heads=kv_heads,
        norm1_w=(jnp.ones((E,), jnp.float32) + nrm(ks[0], (E,))).reshape(1, E),
        norm2_w=(jnp.ones((E,), jnp.float32) + nrm(ks[1], (E,))).reshape(1, E),
        wqkv=wqkv, bqkv=bqkv,
        rope_cos=jnp.cos(freqs), rope_sin=jnp.sin(freqs),
        ln_g=jnp.ones((1, E), jnp.float32),
        ln_b=jnp.zeros((1, E), jnp.float32),
        wo=nrm(ks[8], (E, E)).astype(jnp.bfloat16),
        bo=nrm(ks[9], (E,)).reshape(1, E),
        w1=nrm(ks[10], (E, h)).astype(jnp.bfloat16),
        w3=nrm(ks[11], (E, h)).astype(jnp.bfloat16),
        w2=nrm(ks[12], (h, E)).astype(jnp.bfloat16),
    )


if __name__ == "__main__":
    B, S, E = 2, 8, 32
    Hq, Hk = 4, 2
    key = jax.random.PRNGKey(0)
    pkey, xkey = jax.random.split(key)
    # hidden_dim=96, multiple_of=64 -> FFN hidden size 64 (small test shape).
    params = make_params(pkey, E, Hq, Hk, S, hidden_dim=96, multiple_of=64)
    x = jax.random.normal(xkey, (B, S, E), jnp.float32)

    out = llama_block_forward(params, x, is_causal=True)
    out = jax.block_until_ready(out)
    assert out.shape == (B, S, E)
    assert bool(jnp.all(jnp.isfinite(out)))
    print("KERNEL_OK")
</pallas_src>

<mosaic_0001>
module attributes {stable_mosaic.version = 11 : i64} {
  func.func @_rms_qkv_rope_kernel(%arg0: i32, %arg1: i32, %arg2: i32, %arg3: memref<1x8x32xf32, #tpu.memory_space<vmem>>, %arg4: memref<1x32xf32, #tpu.memory_space<vmem>>, %arg5: memref<1x32x8xbf16, #tpu.memory_space<vmem>>, %arg6: memref<1x1x8xf32, #tpu.memory_space<vmem>>, %arg7: memref<8x4xf32, #tpu.memory_space<vmem>>, %arg8: memref<8x4xf32, #tpu.memory_space<vmem>>, %arg9: memref<1x1x8x8xbf16, #tpu.memory_space<vmem>>, %arg10: memref<8x32xbf16, #tpu.memory_space<vmem>>) attributes {dimension_semantics = [#tpu.dimension_semantics<parallel>, #tpu.dimension_semantics<parallel>, #tpu.dimension_semantics<arbitrary>], iteration_bounds = array<i64: 2, 1, 8>, scalar_prefetch = 0 : i64, scratch_operands = 1 : i64, tpu.core_type = #tpu.core_type<tc>, window_params = [{transform_indices = @transform_0, window_bounds = array<i64: 1, 8, 32>}, {pipeline_mode = #tpu.pipeline_mode<synchronous>, transform_indices = @transform_1, window_bounds = array<i64: 1, 32>}, {transform_indices = @transform_2, window_bounds = array<i64: 1, 32, 8>}, {transform_indices = @transform_3, window_bounds = array<i64: 1, 1, 8>}, {transform_indices = @transform_4, window_bounds = array<i64: 8, 4>}, {transform_indices = @transform_5, window_bounds = array<i64: 8, 4>}, {transform_indices = @transform_6, window_bounds = array<i64: 1, 1, 8, 8>}]} {
    %c0_i32 = arith.constant 0 : i32
    %0 = arith.cmpi eq, %arg2, %c0_i32 : i32
    %1 = arith.extui %0 : i1 to i32
    %c0_i32_0 = arith.constant 0 : i32
    %2 = arith.cmpi ne, %1, %c0_i32_0 : i32
    scf.if %2 {
      %c0_11 = arith.constant 0 : index
      %c0_12 = arith.constant 0 : index
      %c0_13 = arith.constant 0 : index
      %17 = vector.load %arg3[%c0_11, %c0_12, %c0_13] : memref<1x8x32xf32, #tpu.memory_space<vmem>>, vector<1x8x32xf32>
      %18 = vector.shape_cast %17 : vector<1x8x32xf32> to vector<8x32xf32>
      %19 = arith.mulf %18, %18 : vector<8x32xf32>
      %cst_14 = arith.constant dense<0.000000e+00> : vector<8xf32>
      %20 = vector.multi_reduction <add>, %19, %cst_14 [1] : vector<8x32xf32> to vector<8xf32>
      %21 = vector.shape_cast %20 : vector<8xf32> to vector<8x1xf32>
      %cst_15 = arith.constant 3.200000e+01 : f32
      %22 = vector.broadcast %cst_15 : f32 to vector<8x1xf32>
      %23 = arith.divf %21, %22 : vector<8x1xf32>
      %cst_16 = arith.constant 9.99999997E-7 : f32
      %24 = vector.broadcast %cst_16 : f32 to vector<8x1xf32>
      %25 = arith.addf %23, %24 : vector<8x1xf32>
      %26 = math.rsqrt %25 : vector<8x1xf32>
      %27 = vector.broadcast %26 : vector<8x1xf32> to vector<8x32xf32>
      %28 = arith.mulf %18, %27 : vector<8x32xf32>
      %c0_17 = arith.constant 0 : index
      %c0_18 = arith.constant 0 : index
      %29 = vector.load %arg4[%c0_17, %c0_18] : memref<1x32xf32, #tpu.memory_space<vmem>>, vector<1x32xf32>
      %30 = vector.broadcast %29 : vector<1x32xf32> to vector<8x32xf32>
      %31 = arith.mulf %28, %30 : vector<8x32xf32>
      %32 = arith.truncf %31 : vector<8x32xf32> to vector<8x32xbf16>
      %c0_19 = arith.constant 0 : index
      %c0_20 = arith.constant 0 : index
      %33 = vector.load %arg10[%c0_19, %c0_20] : memref<8x32xbf16, #tpu.memory_space<vmem>>, vector<8x32xbf16>
      tpu.vector_store %arg10[%c0_19, %c0_20], %32 {strides = array<i32>} : memref<8x32xbf16, #tpu.memory_space<vmem>>, vector<8x32xbf16>,
    } else {
    }
    %c0 = arith.constant 0 : index
    %c0_1 = arith.constant 0 : index
    %3 = vector.load %arg10[%c0, %c0_1] : memref<8x32xbf16, #tpu.memory_space<vmem>>, vector<8x32xbf16>
    %c0_2 = arith.constant 0 : index
    %c0_3 = arith.constant 0 : index
    %c0_4 = arith.constant 0 : index
    %4 = vector.load %arg5[%c0_2, %c0_3, %c0_4] : memref<1x32x8xbf16, #tpu.memory_space<vmem>>, vector<1x32x8xbf16>
    %5 = vector.shape_cast %4 : vector<1x32x8xbf16> to vector<32x8xbf16>
    %cst = arith.constant dense<0.000000e+00> : vector<8x8xf32>
    %6 = tpu.matmul %3, %5, %cst {dimension_numbers = #tpu.dot_dimension_numbers<[1], [0], [0], [1], [0, 0, 1, 1], [], []>} : vector<8x32xbf16>, vector<32x8xbf16>, vector<8x8xf32> -> vector<8x8xf32>
    %c0_5 = arith.constant 0 : index
    %c0_6 = arith.constant 0 : index
    %c0_7 = arith.constant 0 : index
    %7 = vector.load %arg6[%c0_5, %c0_6, %c0_7] : memref<1x1x8xf32, #tpu.memory_space<vmem>>, vector<1x1x8xf32>
    %8 = vector.shape_cast %7 : vector<1x1x8xf32> to vector<1x8xf32>
    %9 = vector.broadcast %8 : vector<1x8xf32> to vector<8x8xf32>
    %10 = arith.addf %6, %9 : vector<8x8xf32>
    %c6_i32 = arith.constant 6 : i32
    %11 = arith.cmpi slt, %arg2, %c6_i32 : i32
    %12 = arith.extui %11 : i1 to i32
    %c0_i32_8 = arith.constant 0 : i32
    %13 = arith.cmpi ne, %12, %c0_i32_8 : i32
    scf.if %13 {
      %c0_11 = arith.constant 0 : index
      %c0_12 = arith.constant 0 : index
      %17 = vector.load %arg7[%c0_11, %c0_12] : memref<8x4xf32, #tpu.memory_space<vmem>>, vector<8x4xf32>
      %c0_13 = arith.constant 0 : index
      %c0_14 = arith.constant 0 : index
      %18 = vector.load %arg8[%c0_13, %c0_14] : memref<8x4xf32, #tpu.memory_space<vmem>>, vector<8x4xf32>
      %19 = vector.extract_strided_slice %10 {offsets = [0, 0], sizes = [8, 4], strides = [1, 1]} : vector<8x8xf32> to vector<8x4xf32>
      %20 = vector.extract_strided_slice %10 {offsets = [0, 4], sizes = [8, 4], strides = [1, 1]} : vector<8x8xf32> to vector<8x4xf32>
      %21 = arith.mulf %19, %17 : vector<8x4xf32>
      %22 = arith.mulf %20, %18 : vector<8x4xf32>
      %23 = arith.subf %21, %22 : vector<8x4xf32>
      %24 = arith.mulf %20, %17 : vector<8x4xf32>
      %25 = arith.mulf %19, %18 : vector<8x4xf32>
      %26 = arith.addf %24, %25 : vector<8x4xf32>
      %27 = tpu.concatenate %23, %26 in 1 : vector<8x4xf32>, vector<8x4xf32> -> vector<8x8xf32>
      %28 = arith.truncf %27 : vector<8x8xf32> to vector<8x8xbf16>
      %c0_15 = arith.constant 0 : index
      %c0_16 = arith.constant 0 : index
      %c0_17 = arith.constant 0 : index
      %c0_18 = arith.constant 0 : index
      %29 = vector.load %arg9[%c0_15, %c0_16, %c0_17, %c0_18] : memref<1x1x8x8xbf16, #tpu.memory_space<vmem>>, vector<1x1x8x8xbf16>
      %30 = vector.shape_cast %29 : vector<1x1x8x8xbf16> to vector<8x8xbf16>
      %31 = vector.shape_cast %28 : vector<8x8xbf16> to vector<1x1x8x8xbf16>
      tpu.vector_store %arg9[%c0_15, %c0_16, %c0_17, %c0_18], %31 {strides = array<i32>} : memref<1x1x8x8xbf16, #tpu.memory_space<vmem>>, vector<1x1x8x8xbf16>,
    } else {
    }
    %c6_i32_9 = arith.constant 6 : i32
    %14 = arith.cmpi sge, %arg2, %c6_i32_9 : i32
    %15 = arith.extui %14 : i1 to i32
    %c0_i32_10 = arith.constant 0 : i32
    %16 = arith.cmpi ne, %15, %c0_i32_10 : i32
    scf.if %16 {
      %17 = arith.truncf %10 : vector<8x8xf32> to vector<8x8xbf16>
      %c0_11 = arith.constant 0 : index
      %c0_12 = arith.constant 0 : index
      %c0_13 = arith.constant 0 : index
      %c0_14 = arith.constant 0 : index
      %18 = vector.load %arg9[%c0_11, %c0_12, %c0_13, %c0_14] : memref<1x1x8x8xbf16, #tpu.memory_space<vmem>>, vector<1x1x8x8xbf16>
      %19 = vector.shape_cast %18 : vector<1x1x8x8xbf16> to vector<8x8xbf16>
      %20 = vector.shape_cast %17 : vector<8x8xbf16> to vector<1x1x8x8xbf16>
      tpu.vector_store %arg9[%c0_11, %c0_12, %c0_13, %c0_14], %20 {strides = array<i32>} : memref<1x1x8x8xbf16, #tpu.memory_space<vmem>>, vector<1x1x8x8xbf16>,
    } else {
    }
    return
  }
  func.func @transform_0(%arg0: i32, %arg1: i32, %arg2: i32) -> (i32, i32, i32) {
    %c0_i32 = arith.constant 0 : i32
    %c0_i32_0 = arith.constant 0 : i32
    return %arg0, %arg1, %c0_i32 : i32, i32, i32
  }
  func.func @transform_1(%arg0: i32, %arg1: i32, %arg2: i32) -> (i32, i32) {
    %c0_i32 = arith.constant 0 : i32
    %c0_i32_0 = arith.constant 0 : i32
    %c0_i32_1 = arith.constant 0 : i32
    return %c0_i32, %c0_i32_0 : i32, i32
  }
  func.func @transform_2(%arg0: i32, %arg1: i32, %arg2: i32) -> (i32, i32, i32) {
    %c0_i32 = arith.constant 0 : i32
    %c0_i32_0 = arith.constant 0 : i32
    %c0_i32_1 = arith.constant 0 : i32
    return %arg2, %c0_i32, %c0_i32_0 : i32, i32, i32
  }
  func.func @transform_3(%arg0: i32, %arg1: i32, %arg2: i32) -> (i32, i32, i32) {
    %c0_i32 = arith.constant 0 : i32
    %c0_i32_0 = arith.constant 0 : i32
    %c0_i32_1 = arith.constant 0 : i32
    return %arg2, %c0_i32, %c0_i32_0 : i32, i32, i32
  }
  func.func @transform_4(%arg0: i32, %arg1: i32, %arg2: i32) -> (i32, i32) {
    %c0_i32 = arith.constant 0 : i32
    %c0_i32_0 = arith.constant 0 : i32
    return %arg1, %c0_i32 : i32, i32
  }
  func.func @transform_5(%arg0: i32, %arg1: i32, %arg2: i32) -> (i32, i32) {
    %c0_i32 = arith.constant 0 : i32
    %c0_i32_0 = arith.constant 0 : i32
    return %arg1, %c0_i32 : i32, i32
  }
  func.func @transform_6(%arg0: i32, %arg1: i32, %arg2: i32) -> (i32, i32, i32, i32) {
    %c0_i32 = arith.constant 0 : i32
    %c0_i32_0 = arith.constant 0 : i32
    return %arg0, %arg2, %arg1, %c0_i32 : i32, i32, i32, i32
  }
}

</mosaic_0001>

<bundles_post_ra>
// kernel: tpu_custom_call.1
= control target key start
LH: loop header
LB: loop body
LE: loop exit
PB: predicated region body
PF: predicated region fallthrough
CT: control target
= control target key end

     0   :  { %11 = vsyncpa [#allocation4], 0  ;;  %s1048_s0 = inlined_call_operand.vmem [shape: f32[2,8,32], index: 0, kind: input, shape index: {}]   ;;  %s1049_s1 = inlined_call_operand.vmem [shape: f32[1,32], index: 1, kind: input, shape index: {}]   ;;  %s1050_s2 = inlined_call_operand.vmem [shape: bf16[8,32,8], index: 2, kind: input, shape index: {}]   ;;  %s1051_s3 = inlined_call_operand.vmem [shape: f32[8,1,8], index: 3, kind: input, shape index: {}]   ;;  %s1052_s4 = inlined_call_operand.vmem [shape: f32[8,4], index: 4, kind: input, shape index: {}]   ;;  %s1053_s5 = inlined_call_operand.vmem [shape: f32[8,4], index: 5, kind: input, shape index: {}]   ;;  %s1054_s6 = inlined_call_operand.hbm [shape: bf16[2,8,8,8], index: 6, kind: output, shape index: {}]  }
   0x1   :  { %13 = vsyncpa [#allocation4 + $0x1], 0  ;;  %s882_s21 = smov 0   ;;  %s884_s22 = smov 0  }
   0x2   :  { %s886_s23 = smov 0   ;;  %s888_s24 = smov 0  }
   0x3   :  { %s890_s25 = smov 0   ;;  %s892_s26 = smov 0  }
   0x4   :  { %s894_s27 = smov 0   ;;  %s896_s28 = smov 0  }
   0x5 LB: > { %1060 = sst [smem:[#allocation6_spill]] %s832_s26  ;;  %s631_s29 = sadd.s32 4294967295, %s840_s28   ;;  %s840_s28 = sphi %s896_s28, %s19_s28   ;;  %s836_s27 = sphi %s894_s27, %s1070_s27   ;;  %s832_s26 = sphi %s892_s26, %s1069_s26   ;;  %s828_s25 = sphi %s890_s25, %s1068_s25   ;;  %s824_s24 = sphi %s888_s24, %s1067_s24   ;;  %s820_s23 = sphi %s886_s23, %s1073_s23   ;;  %s816_s22 = sphi %s884_s22, %s1072_s22   ;;  %s812_s21 = sphi %s882_s21, %s1071_s21  }
   0x6   : > { %1061 = sst [smem:[#allocation7_spill]] %s836_s27  ;;  %s632_s30 = sadd.s32 4294967294, %s840_s28  }
   0x7   : > { %s31_s7 = sadd.s32 1, %s832_s26  ;;  %s38_s8 = sadd.s32 1, %s836_s27 }
   0x8   : > { %p32_p0 = scmp.ge.s32.totalorder %s31_s7, 8  ;;  %p212_p1 = scmp.ne.s32.totalorder %s820_s23, %s816_s22 }
   0x9   : > { %p213_p2 = scmp.eq.s32.totalorder %s631_s29, 15  ;;  %p218_p5 = scmp.ne.s32.totalorder %s816_s22, %s812_s21 }
   0xa   : > { %s1075_s7 = smov (%p32_p0, %s31_s7), 0  ;;  %s1077_s8 = smov (!%p32_p0, %s38_s8), %s836_s27 }
   0xb   : > { %1062 = sst [smem:[#allocation8_spill]] %s1075_s7  ;;  %s196_s9 = ssub.s32 %s832_s26, %s1075_s7 }
   0xc   : > { %p933_p3 = por %p213_p2, %p212_p1  ;;  %p40_p4 = scmp.ge.s32.totalorder %s1077_s8, 2 }
   0xd   : > { %p219_p6 = scmp.eq.s32.totalorder %s632_s30, 15  ;;  %p637_p7 = scmp.ge.s32.totalorder %s840_s28, 1 }
   0xe   : > { %s1079_s8 = smov (%p40_p4, %s1077_s8), 0  ;;  %p278_p9 = scmp.lt.s32.totalorder %s840_s28, 17 }
   0xf   : > { %1064 = sst [smem:[#allocation9_spill]] %s1079_s8  ;;  %p942_p8 = por %p219_p6, %p218_p5 }
  0x10   : > { %s195_s12 = ssub.s32 %s836_s27, %s1079_s8  ;;  %s202_s13 = sadd.s32 1, %s820_s23 }
  0x11   : > { %s197_s14 = sor.u32 %s196_s9, %s195_s12  ;;  %p279_p10 = pnand %p637_p7, %p278_p9 }
  0x12   : > { %p200_p11 = scmp.eq.s32.totalorder %s197_s14, 0  ;;  %s1058_s16 = sand.u32 (!%p279_p10), 1, %s816_s22  }
  0x13   : > { %282 = sbr.rel (%p279_p10) target bundleno = 583 (0x247), region = 44  ;;  %p326_p12 = scmp.lt.s32.totalorder (!%p279_p10), %s828_s25, 1 }
  0x14   : > { %s951_s15 = scalar_select %p200_p11, %s820_s23, %s202_s13  }
  0x15   : > { %s638_s17 = sshll.u32 (!%p279_p10), %s1058_s16, 2  ;;  %p333_p13 = scmp.lt.s32.totalorder (!%p279_p10), %s824_s24, 7 }
  0x16   : > { %s973_s26 = scalar_lea.vmem (!%p279_p10), [#allocation3], %s638_s17  ;;  %p642_p0 = scmp.ne.s32.totalorder (!%p279_p10), %s824_s24, 0 }
  0x1a   : > { %s327_s18 = scalar_select %p326_p12, %s828_s25, 1 }
  0x1b   : > { %s960_s19 = scalar_select %p333_p13, %s824_s24, 7 }
  0x1c   : > { %s639_s20 = sshll.u32 %s327_s18, 3  ;;  %353 = sbr.rel (%p642_p0) target bundleno = 198 (0xc6), region = 48  ;;  %vm356_vm0 = vcmask (!%p642_p0), 261120   ;;  %v643_v7 = vld [vmem:[%s1049_s1] ss:$0 sm:$0xff] (!%p642_p0)  ;;  %vm374_vm1 = vcmask (!%p642_p0), 257024  }
  0x1d   : > { %s332_s9 = scalar_lea.vmem %s1048_s0, %s639_s20  ;;  %s655_s12 = sshll.u32 %s960_s19, 4 }
  0x1e   : > { %s337_s8 = scalar_lea.vmem %s1050_s2, %s655_s12  ;;  %s340_s16 = scalar_lea.vmem %s1051_s3, %s960_s19  ;;  %v354_v0 = vld [vmem:[%s332_s9] sm:$0xff] (!%p642_p0) }
  0x1f   : > { %v355_v1 = vmul.f32 (!%p642_p0), %v354_v0, %v354_v0 }
  0x21   : > { %v357_v2 = vsel (!%p642_p0), %vm356_vm0, %v355_v1, 0.0 }
  0x22   : > { %358 = vadd.xlane.f32.xlu0 (!%p642_p0), %v357_v2 }
  0xaf   : > { %v359_v3 = vpop.xlane.xlu0 %358 }
  0xb0   : > { %v361_v4 = vmul.f32 0.03125, %v359_v3 }
  0xb2   : > { %v362_v5 = vadd.f32 1e-06, %v361_v4 }
  0xb4   : > { %742 = vrsqrt.f32 %v362_v5 }
  0xbe   : > { %v743_v6 = vpop.eup %742 }
  0xbf   : > { %v364_v8 = vmul.f32 %v743_v6, %v354_v0 }
  0xc1   : > { %v372_v9 = vmul.f32 %v643_v7, %v364_v8 }
  0xc3   : > { %v373_v10 = vpack.c.bf16 %v372_v9, %v372_v9 }
  0xc5   : > { %375 = vst.msk [vmem:[#allocation2] sm:$0xf] %vm374_vm1, %v373_v10 }
  0xc6 PF: > { %v744_v11 = vld [vmem:[%s337_s8] sm:$0xff]   ;;  %v842_v12 = vmov 0.0   ;;  %v745_v13 = vld [vmem:[%s337_s8 + $0x8] sm:$0xff]   ;;  %vm843_vm2 = vmmov 0   ;;  %vm400_vm3 = vcmask 261120   ;;  %p648_p1 = scmp.ge.s32.totalorder %s824_s24, 6 }
  0xc7   : > { %659 = vmatprep.subr.bf16.mxu0 %v842_v12  ;;  %663 = vmatprep.mubr.msk.bf16.mxu0 %vm843_vm2, %v842_v12  ;;  %v644_v15 = vld [vmem:[%s340_s16] ss:$0 sm:$0xff]  ;;  %s844_s29 = smov (!%p648_p1), 4   ;;  %s845_s16 = smov (!%p648_p1), 124   ;;  %vm472_vm4 = vcmask (!%p648_p1), 31744   ;;  %vm475_vm5 = vcmask (!%p648_p1), 60416  }
  0xc8   : > { %660 = vmatpush3.bf16.msra.mxu0 %v744_v11  ;;  %v449_v21 = vld [vmem:[%s1053_s5] sm:$0xff] (!%p648_p1) }
  0xc9   : > { %661 = vmatprep.subr.bf16.mxu0 %v842_v12  ;;  %452 = vrot.lane.b32.xlu0 (!%p648_p1), %v449_v21, %s844_s29  ;;  %v448_v22 = vld [vmem:[%s1052_s4] sm:$0xff] (!%p648_p1) }
  0xcc   : > { %662 = vmatpush3.bf16.msra.mxu0 %v745_v13  ;;  %v376_v14 = vld [vmem:[#allocation2] sm:$0xf] }
  0xcd   : > { %462 = vrot.lane.b32.xlu0 (!%p648_p1), %v448_v22, %s844_s29 }
  0xcf   : > { %664 = vmatmul.mubr.msk.bf16.vlgmr.msra.gmra.mrb[0].mxu0 %vm400_vm3, %v376_v14 }
 0x13b   : > { %v453_v23 = vpop.permute.xlu0 (!%p648_p1), %452 }
 0x13f   : > { %v463_v26 = vpop.permute.xlu0 (!%p648_p1), %462 }
 0x19f   : > { %447 = sbr.rel (%p648_p1) target bundleno = 548 (0x224), region = 52 }
 0x1a2   : > { %v438_v16 = vpop.f32.mrb[0].mxu0 }
 0x1a3   : > { %v439_v17 = vadd.f32 %v644_v15, %v438_v16  ;;  %v665_v18 = vpop.f32.mrb[1].mxu0 }
 0x1a4   : > { %v441_v19 = vpop.f32.mrb[2].mxu0 }
 0x1a5   : > { %v666_v20 = vpop.f32.mrb[3].mxu0  ;;  %v455_v24 = vmul.f32 (!%p648_p1), %v453_v23, %v439_v17  ;;  %v466_v25 = vmul.f32 (!%p648_p1), %v449_v21, %v439_v17  ;;  %v450_v28 = vmul.f32 (!%p648_p1), %v448_v22, %v439_v17  ;;  %v465_v29 = vmul.f32 (!%p648_p1), %v463_v26, %v439_v17 }
 0x1a7   : > { %457 = vrot.lane.b32.xlu1 %v455_v24, %s845_s16 }
 0x1ab   : > { %468 = vrot.lane.b32.xlu1 %v466_v25, %s844_s29 }
 0x219   : > { %v458_v27 = vpop.permute.xlu1 %457 }
 0x21a   : > { %v460_v31 = vsub.f32 %v450_v28, %v458_v27 }
 0x21d   : > { %v469_v30 = vpop.permute.xlu1 %468 }
 0x21e   : > { %v471_v32 = vadd.f32 %v469_v30, %v465_v29 }
 0x220   : > { %v473_v33 = vsel %vm472_vm4, %v460_v31, %v471_v32 }
 0x221   : > { %v474_v34 = vpack.c.bf16 %v473_v33, %v473_v33 }
 0x223   : > { %476 = vst.msk [vmem:[%s973_s26] sm:$0xf] %vm475_vm5, %v474_v34 }
 0x224 PF: > { %p649_p2 = scmp.lt.s32.totalorder %s824_s24, 6 }
 0x225   : > { %v481_v35 = vpack.c.bf16 (!%p649_p2), %v439_v17, %v439_v17  ;;  %vm482_vm6 = vcmask (!%p649_p2), 60416  }
 0x226   : > { %480 = sbr.rel (%p649_p2) target bundleno = 557 (0x22d), region = 56 }
 0x227   : > { %483 = vst.msk [vmem:[%s973_s26] sm:$0xf] (!%p649_p2), %vm482_vm6, %v481_v35 }
 0x22d PF: > { %s651_s19 = sshll.u32 %s828_s25, 3  ;;  %s501_s13 = sshll.u32 %s973_s26, 4  ;;  %s997_s13 = int_to_ptr.vmem [resolvable:$true] %s501_s13 }
 0x22e   : > { %s497_s12 = sadd.s32 %s824_s24, %s651_s19  ;;  %s1066_s7 = sand.u32 1, %s816_s22  }
 0x22f   : > { %s652_s14 = sshll.u32 %s497_s12, 6  ;;  %s485_s8 = scalar_lea.sflag [#allocation4], %s1066_s7 }
 0x230   : > { %s499_s27 = scalar_lea.hbm %s1054_s6, %s652_s14  ;;  %s746_s17 = scalar_lea.vmem %s997_s13, 64 }
 0x231   : > { %p747_p4 = scmp.ne.s32.totalorder %s997_s13, %s746_s17  ;;  %s846_s25 = smov [#allocation3]  }
 0x232   : > { %s750_s24 = sshll.u32 %s846_s25, 4  ;;  %s751_s24 = int_to_ptr.vmem [resolvable:$false] %s750_s24 }
 0x233   : > { %p748_p5 = pnand %p747_p4, %p933_p3  ;;  %s752_s26 = scalar_lea.vmem %s751_s24, 128 }
 0x234   : > { %p753_p7 = scmp.lt.s32.totalorder %s997_s13, %s751_s24  ;;  %p754_p9 = scmp.lt.s32.totalorder %s752_s26, %s746_s17 }
 0x235   : > { %p749_p6 = pneg %p748_p5 }
 0x236   : > { %p755_p10 = por %p754_p9, %p753_p7 }
 0x238   : > { %p756_p11 = pnand %p755_p10, %p749_p6 }
 0x23a   : > { %759 = shalt.err (!%p756_p11)
}
 0x23b   : > { %s760_s29 = scalar_lea.hbm %s499_s27, 64  ;;  %s764_s16 = scalar_lea.hbm %s1054_s6, 1024 }
 0x23c   : > { %p761_p12 = scmp.ne.s32.totalorder %s499_s27, %s760_s29  ;;  %p765_p1 = scmp.lt.u32.totalorder %s499_s27, %s1054_s6 }
 0x23d   : > { %p766_p2 = scmp.lt.u32.totalorder %s764_s16, %s760_s29  ;;  %p768_p5 = scmp.lt.u32.totalorder %s760_s29, %s499_s27 }
 0x23e   : > { %p762_p13 = pnand %p761_p12, %p933_p3 }
 0x23f   : > { %p767_p4 = por %p766_p2, %p765_p1 }
 0x240   : > { %p763_p0 = pneg %p762_p13 }
 0x241   : > { %p769_p7 = por %p768_p5, %p767_p4 }
 0x243   : > { %p770_p6 = pnand %p769_p7, %p763_p0 }
 0x245   : > { %773 = shalt.err (!%p770_p6)
}
 0x246   : > { %667 = dma.vmem_to_hbm [thread:$0]  (%p933_p3), %s997_s13, 64, %s499_s27, %s485_s8  }
 0x247 PF: > { %p673_p9 = scmp.ge.s32.totalorder %s840_s28, 2  ;;  %s513_s14 = sand.u32 1, %s812_s21  }
 0x248   : > { %s514_s18 = scalar_lea.sflag [#allocation4], %s513_s14 }
 0x249   : > { %p670_p10 = pnand %p673_p9, %p942_p8 }
 0x24b   : > { %807 = dma.done.wait (!%p670_p10), %s514_s18, 64  }
 0x24c   : > { %809 = vsyncadd (!%p670_p10), %s514_s18, 4294967232  ;;  %s19_s28 = sadd.s32 1, %s840_s28   ;;  %s1067_s24 = sld [smem:[#allocation6_spill]] }
 0x24d   : > { %p16_p11 = scmp.ge.s32.totalorder %s19_s28, 18   ;;  %s1068_s25 = sld [smem:[#allocation7_spill]] }
 0x24e   : > { %s1069_s26 = sld [smem:[#allocation8_spill]]  ;;  %s1070_s27 = sld [smem:[#allocation9_spill]] }
 0x24f   : > { %s1071_s21 = smov %s816_s22  ;;  %s1072_s22 = smov %s820_s23 }
 0x250   : > { %s1073_s23 = smov %s951_s15  ;;  %18 = sbr.rel (!%p16_p11) target bundleno = 5 (0x5), region = 103 }
 0x257   :  { %519 = vsyncpa [#allocation4], 1 }
 0x258   :  { %521 = vsyncpa [#allocation4 + $0x1], 1 }

</bundles_post_ra>
